<compile_context>
chip_gen: v5e
topology: v5e:2x2
jax: 0.10.0
libtpu: 0.0.40
codegen_flags: <defaults>
</compile_context>

<pallas_src>
import math

import jax
import jax.numpy as jnp
from jax.experimental import pallas as pl
from jax.experimental.pallas import tpu as pltpu


_GELU_C = math.sqrt(2.0 / math.pi)


def _new_gelu_f32(x):
    # Exact OpenAI NewGELU: 0.5*x*(1 + tanh(sqrt(2/pi)*(x + 0.044715*x^3)))
    return 0.5 * x * (1.0 + jnp.tanh(_GELU_C * (x + 0.044715 * x * x * x)))


# ----------------------------- fused MLP kernel --------------------------------
def _fused_mlp_kernel(x_ref, wfc_ref, bfc_ref, wpj_ref, bpj_ref, o_ref, acc_ref):
    """One (tm, C) row block of y = c_proj(NewGELU(c_fc(x))).

    Grid = (M//tm, H//th). The x row block and the f32 accumulator stay
    resident across the hidden-chunk axis; the activated hidden tile lives
    only in vregs/VMEM, never in HBM.
    """
    h_step = pl.program_id(1)

    @pl.when(h_step == 0)
    def _():
        acc_ref[...] = jnp.zeros_like(acc_ref)

    # c_fc slice (bf16 MXU, f32 result) + bias + exact NewGELU in f32.
    pre = jnp.dot(x_ref[...], wfc_ref[...], preferred_element_type=jnp.float32)
    pre = pre + bfc_ref[...].astype(jnp.float32)
    hact = _new_gelu_f32(pre)

    # c_proj partial contraction over this hidden chunk (bf16 MXU, f32 acc).
    acc_ref[...] += jnp.dot(
        hact.astype(wpj_ref.dtype), wpj_ref[...], preferred_element_type=jnp.float32
    )

    @pl.when(h_step == pl.num_programs(1) - 1)
    def _():
        o_ref[...] = (acc_ref[...] + bpj_ref[...].astype(jnp.float32)).astype(
            o_ref.dtype
        )


def _pick_hidden_tile(H):
    # Prefer 256-multiples (v6e/v7x MXU is 2x256^2); fall back to whole H.
    for th in (1024, 768, 512, 384, 256, 128):
        if H % th == 0:
            return th
    return H


# ------------------------------- MLP forward -----------------------------------
def mlp_forward(
    x,
    w_fc,
    b_fc,
    w_proj,
    b_proj,
    *,
    row_tile=512,
    hidden_tile=None,
    mxu_dtype=jnp.bfloat16,
):
    """x: (B, T, C); w_fc: (C, 4C); w_proj: (4C, C) -> (B, T, C)."""
    orig_dtype = x.dtype
    B, T, C = x.shape
    C_fc, H = w_fc.shape
    H_pj, C_out = w_proj.shape
    assert C_fc == C and H_pj == H and C_out == C, (x.shape, w_fc.shape, w_proj.shape)

    M = B * T
    x2d = x.reshape(M, C)

    # Row-block size: 512 for big M (keeps >=2 parallel blocks for megacore),
    # otherwise the whole (8-padded) M. Pad M so every row block is full
    # (unmasked, lane/sublane aligned stores), then slice the padding off.
    if M >= row_tile:
        tm = row_tile
    else:
        tm = max(8, -(-M // 8) * 8)
    M_pad = -(-M // tm) * tm
    if M_pad != M:
        x2d = jnp.pad(x2d, ((0, M_pad - M), (0, 0)))

    th = hidden_tile if hidden_tile is not None else _pick_hidden_tile(H)
    assert H % th == 0, (H, th)

    # bf16 operands to the MXU (f32 accumulation in-kernel): ~2-4x MXU
    # throughput (esp. v5e) and half the HBM->VMEM DMA bytes.
    x2d_c = x2d.astype(mxu_dtype)
    w_fc_c = w_fc.astype(mxu_dtype)
    w_proj_c = w_proj.astype(mxu_dtype)
    b_fc_2d = b_fc.reshape(1, H).astype(jnp.float32)
    b_pj_2d = b_proj.reshape(1, C).astype(jnp.float32)

    grid = (M_pad // tm, H // th)

    itemsize = jnp.dtype(mxu_dtype).itemsize
    cost = pl.CostEstimate(
        flops=4 * M_pad * C * H,          # two matmuls
        transcendentals=M_pad * H,        # tanh
        bytes_accessed=(
            M_pad * C * itemsize          # x
            + C * H * itemsize            # w_fc
            + H * C * itemsize            # w_proj
            + (H + C) * 4                 # biases
            + M_pad * C * jnp.dtype(orig_dtype).itemsize  # y
        ),
    )

    y2d = pl.pallas_call(
        _fused_mlp_kernel,
        out_shape=jax.ShapeDtypeStruct((M_pad, C), orig_dtype),
        grid_spec=pltpu.PrefetchScalarGridSpec(
            num_scalar_prefetch=0,
            grid=grid,
            in_specs=[
                pl.BlockSpec((tm, C), lambda i, h: (i, 0)),   # x rows (resident over h)
                pl.BlockSpec((C, th), lambda i, h: (0, h)),   # w_fc column chunk
                pl.BlockSpec((1, th), lambda i, h: (0, h)),   # b_fc chunk
                pl.BlockSpec((th, C), lambda i, h: (h, 0)),   # w_proj row chunk
                pl.BlockSpec((1, C), lambda i, h: (0, 0)),    # b_proj (fixed block)
            ],
            out_specs=pl.BlockSpec((tm, C), lambda i, h: (i, 0)),
            scratch_shapes=[pltpu.VMEM((tm, C), jnp.float32)],
        ),
        compiler_params=pltpu.CompilerParams(
            dimension_semantics=("parallel", "arbitrary"),
        ),
        cost_estimate=cost,
    )(x2d_c, w_fc_c, b_fc_2d, w_proj_c, b_pj_2d)

    return y2d[:M].reshape(B, T, C)


# --------------------------- Reference (pure JAX) -------------------------------
def _new_gelu_ref(x):
    return 0.5 * x * (
        1.0 + jnp.tanh(math.sqrt(2.0 / math.pi) * (x + 0.044715 * jnp.power(x, 3.0)))
    )


def reference_forward(x, w_fc, b_fc, w_proj, b_proj):
    hp = jax.lax.Precision.HIGHEST
    h = _new_gelu_ref(jnp.matmul(x, w_fc, precision=hp) + b_fc)
    return jnp.matmul(h, w_proj, precision=hp) + b_proj


if __name__ == "__main__":
    # Small GPT-style config. T=66 makes M=B*T=132 non-tile-aligned on purpose
    # (exercises the padding path); hidden_tile=256 forces 2 hidden-chunk
    # accumulation steps so the init/accumulate/finalize logic is exercised.
    B, T, C = 2, 66, 128
    H = 4 * C

    key = jax.random.PRNGKey(0)
    kx, k1, k2, k3, k4 = jax.random.split(key, 5)

    x = jax.random.normal(kx, (B, T, C), dtype=jnp.float32)
    # c_fc: Linear(C, 4C); c_proj: Linear(4C, C). Stored as (in, out).
    w_fc = jax.random.normal(k1, (C, H), dtype=jnp.float32) * (1.0 / math.sqrt(C))
    b_fc = jax.random.normal(k2, (H,), dtype=jnp.float32) * 0.01
    w_proj = jax.random.normal(k3, (H, C), dtype=jnp.float32) * (1.0 / math.sqrt(H))
    b_proj = jax.random.normal(k4, (C,), dtype=jnp.float32) * 0.01

    y = mlp_forward(x, w_fc, b_fc, w_proj, b_proj, hidden_tile=256)
    y = jax.block_until_ready(y)

    y_ref = reference_forward(x, w_fc, b_fc, w_proj, b_proj)
    assert y.shape == (B, T, C)
    # bf16 MXU operands (f32 accumulation) vs HIGHEST-precision f32 reference:
    # tolerance loosened accordingly.
    assert jnp.allclose(y, y_ref, atol=2e-2, rtol=2e-2), "mismatch vs reference"

    print("KERNEL_OK")
</pallas_src>

<mosaic_0001>
module attributes {stable_mosaic.version = 11 : i64} {
  func.func @_fused_mlp_kernel(%arg0: i32, %arg1: i32, %arg2: memref<136x128xbf16, #tpu.memory_space<vmem>>, %arg3: memref<128x256xbf16, #tpu.memory_space<vmem>>, %arg4: memref<1x256xf32, #tpu.memory_space<vmem>>, %arg5: memref<256x128xbf16, #tpu.memory_space<vmem>>, %arg6: memref<1x128xf32, #tpu.memory_space<vmem>>, %arg7: memref<136x128xf32, #tpu.memory_space<vmem>>, %arg8: memref<136x128xf32, #tpu.memory_space<vmem>>) attributes {dimension_semantics = [#tpu.dimension_semantics<parallel>, #tpu.dimension_semantics<arbitrary>], iteration_bounds = array<i64: 1, 2>, scalar_prefetch = 0 : i64, scratch_operands = 1 : i64, tpu.core_type = #tpu.core_type<tc>, window_params = [{transform_indices = @transform_0, window_bounds = array<i64: 136, 128>}, {transform_indices = @transform_1, window_bounds = array<i64: 128, 256>}, {transform_indices = @transform_2, window_bounds = array<i64: 1, 256>}, {transform_indices = @transform_3, window_bounds = array<i64: 256, 128>}, {pipeline_mode = #tpu.pipeline_mode<synchronous>, transform_indices = @transform_4, window_bounds = array<i64: 1, 128>}, {transform_indices = @transform_5, window_bounds = array<i64: 136, 128>}]} {
    %c0_i32 = arith.constant 0 : i32
    %0 = arith.cmpi eq, %arg1, %c0_i32 : i32
    %1 = arith.extui %0 : i1 to i32
    %c0_i32_0 = arith.constant 0 : i32
    %2 = arith.cmpi ne, %1, %c0_i32_0 : i32
    scf.if %2 {
      %cst_18 = arith.constant 0.000000e+00 : f32
      %31 = vector.broadcast %cst_18 : f32 to vector<136x128xf32>
      %c0_19 = arith.constant 0 : index
      %c0_20 = arith.constant 0 : index
      %32 = vector.load %arg8[%c0_19, %c0_20] : memref<136x128xf32, #tpu.memory_space<vmem>>, vector<136x128xf32>
      tpu.vector_store %arg8[%c0_19, %c0_20], %31 {strides = array<i32>} : memref<136x128xf32, #tpu.memory_space<vmem>>, vector<136x128xf32>,
    } else {
    }
    %c0 = arith.constant 0 : index
    %c0_1 = arith.constant 0 : index
    %3 = vector.load %arg2[%c0, %c0_1] : memref<136x128xbf16, #tpu.memory_space<vmem>>, vector<136x128xbf16>
    %c0_2 = arith.constant 0 : index
    %c0_3 = arith.constant 0 : index
    %4 = vector.load %arg3[%c0_2, %c0_3] : memref<128x256xbf16, #tpu.memory_space<vmem>>, vector<128x256xbf16>
    %cst = arith.constant dense<0.000000e+00> : vector<136x256xf32>
    %5 = tpu.matmul %3, %4, %cst {dimension_numbers = #tpu.dot_dimension_numbers<[1], [0], [0], [1], [0, 0, 1, 1], [], []>} : vector<136x128xbf16>, vector<128x256xbf16>, vector<136x256xf32> -> vector<136x256xf32>
    %c0_4 = arith.constant 0 : index
    %c0_5 = arith.constant 0 : index
    %6 = vector.load %arg4[%c0_4, %c0_5] : memref<1x256xf32, #tpu.memory_space<vmem>>, vector<1x256xf32>
    %7 = vector.broadcast %6 : vector<1x256xf32> to vector<136x256xf32>
    %8 = arith.addf %5, %7 : vector<136x256xf32>
    %cst_6 = arith.constant 5.000000e-01 : f32
    %9 = vector.broadcast %cst_6 : f32 to vector<136x256xf32>
    %10 = arith.mulf %9, %8 : vector<136x256xf32>
    %cst_7 = arith.constant 4.471500e-02 : f32
    %11 = vector.broadcast %cst_7 : f32 to vector<136x256xf32>
    %12 = arith.mulf %11, %8 : vector<136x256xf32>
    %13 = arith.mulf %12, %8 : vector<136x256xf32>
    %14 = arith.mulf %13, %8 : vector<136x256xf32>
    %15 = arith.addf %8, %14 : vector<136x256xf32>
    %cst_8 = arith.constant 0.797884583 : f32
    %16 = vector.broadcast %cst_8 : f32 to vector<136x256xf32>
    %17 = arith.mulf %16, %15 : vector<136x256xf32>
    %18 = math.tanh %17 : vector<136x256xf32>
    %cst_9 = arith.constant 1.000000e+00 : f32
    %19 = vector.broadcast %cst_9 : f32 to vector<136x256xf32>
    %20 = arith.addf %19, %18 : vector<136x256xf32>
    %21 = arith.mulf %10, %20 : vector<136x256xf32>
    %c0_10 = arith.constant 0 : index
    %c0_11 = arith.constant 0 : index
    %22 = vector.load %arg8[%c0_10, %c0_11] : memref<136x128xf32, #tpu.memory_space<vmem>>, vector<136x128xf32>
    %23 = arith.truncf %21 : vector<136x256xf32> to vector<136x256xbf16>
    %c0_12 = arith.constant 0 : index
    %c0_13 = arith.constant 0 : index
    %24 = vector.load %arg5[%c0_12, %c0_13] : memref<256x128xbf16, #tpu.memory_space<vmem>>, vector<256x128xbf16>
    %cst_14 = arith.constant dense<0.000000e+00> : vector<136x128xf32>
    %25 = tpu.matmul %23, %24, %cst_14 {dimension_numbers = #tpu.dot_dimension_numbers<[1], [0], [0], [1], [0, 0, 1, 1], [], []>} : vector<136x256xbf16>, vector<256x128xbf16>, vector<136x128xf32> -> vector<136x128xf32>
    %26 = arith.addf %22, %25 : vector<136x128xf32>
    %c0_15 = arith.constant 0 : index
    %c0_16 = arith.constant 0 : index
    %27 = vector.load %arg8[%c0_15, %c0_16] : memref<136x128xf32, #tpu.memory_space<vmem>>, vector<136x128xf32>
    tpu.vector_store %arg8[%c0_15, %c0_16], %26 {strides = array<i32>} : memref<136x128xf32, #tpu.memory_space<vmem>>, vector<136x128xf32>,
    %c1_i32 = arith.constant 1 : i32
    %28 = arith.cmpi eq, %arg1, %c1_i32 : i32
    %29 = arith.extui %28 : i1 to i32
    %c0_i32_17 = arith.constant 0 : i32
    %30 = arith.cmpi ne, %29, %c0_i32_17 : i32
    scf.if %30 {
      %c0_18 = arith.constant 0 : index
      %c0_19 = arith.constant 0 : index
      %31 = vector.load %arg8[%c0_18, %c0_19] : memref<136x128xf32, #tpu.memory_space<vmem>>, vector<136x128xf32>
      %c0_20 = arith.constant 0 : index
      %c0_21 = arith.constant 0 : index
      %32 = vector.load %arg6[%c0_20, %c0_21] : memref<1x128xf32, #tpu.memory_space<vmem>>, vector<1x128xf32>
      %33 = vector.broadcast %32 : vector<1x128xf32> to vector<136x128xf32>
      %34 = arith.addf %31, %33 : vector<136x128xf32>
      %c0_22 = arith.constant 0 : index
      %c0_23 = arith.constant 0 : index
      %35 = vector.load %arg7[%c0_22, %c0_23] : memref<136x128xf32, #tpu.memory_space<vmem>>, vector<136x128xf32>
      tpu.vector_store %arg7[%c0_22, %c0_23], %34 {strides = array<i32>} : memref<136x128xf32, #tpu.memory_space<vmem>>, vector<136x128xf32>,
    } else {
    }
    return
  }
  func.func @transform_0(%arg0: i32, %arg1: i32) -> (i32, i32) {
    %c0_i32 = arith.constant 0 : i32
    %c0_i32_0 = arith.constant 0 : i32
    return %arg0, %c0_i32 : i32, i32
  }
  func.func @transform_1(%arg0: i32, %arg1: i32) -> (i32, i32) {
    %c0_i32 = arith.constant 0 : i32
    %c0_i32_0 = arith.constant 0 : i32
    return %c0_i32, %arg1 : i32, i32
  }
  func.func @transform_2(%arg0: i32, %arg1: i32) -> (i32, i32) {
    %c0_i32 = arith.constant 0 : i32
    %c0_i32_0 = arith.constant 0 : i32
    return %c0_i32, %arg1 : i32, i32
  }
  func.func @transform_3(%arg0: i32, %arg1: i32) -> (i32, i32) {
    %c0_i32 = arith.constant 0 : i32
    %c0_i32_0 = arith.constant 0 : i32
    return %arg1, %c0_i32 : i32, i32
  }
  func.func @transform_4(%arg0: i32, %arg1: i32) -> (i32, i32) {
    %c0_i32 = arith.constant 0 : i32
    %c0_i32_0 = arith.constant 0 : i32
    %c0_i32_1 = arith.constant 0 : i32
    return %c0_i32, %c0_i32_0 : i32, i32
  }
  func.func @transform_5(%arg0: i32, %arg1: i32) -> (i32, i32) {
    %c0_i32 = arith.constant 0 : i32
    %c0_i32_0 = arith.constant 0 : i32
    return %arg0, %c0_i32 : i32, i32
  }
}

</mosaic_0001>

<bundles_post_ra>
// kernel: tpu_custom_call.1
= control target key start
LH: loop header
LB: loop body
LE: loop exit
PB: predicated region body
PF: predicated region fallthrough
CT: control target
= control target key end

     0   :  { %s2524_s0 = inlined_call_operand.hbm [shape: bf16[136,128], index: 0, kind: input, shape index: {}]   ;;  %s2525_s1 = inlined_call_operand.hbm [shape: bf16[128,512], index: 1, kind: input, shape index: {}]   ;;  %s2526_s2 = inlined_call_operand.hbm [shape: f32[1,512], index: 2, kind: input, shape index: {}]   ;;  %s2527_s3 = inlined_call_operand.hbm [shape: bf16[512,128], index: 3, kind: input, shape index: {}]   ;;  %s2528_s4 = inlined_call_operand.vmem [shape: f32[1,128], index: 4, kind: input, shape index: {}]   ;;  %s2529_s5 = inlined_call_operand.hbm [shape: f32[136,128], index: 5, kind: output, shape index: {}]  }
   0x1   :  { %2534 = sst [smem:[#allocation20_spill]] %s2524_s0 }
   0x2   :  { %2535 = sst [smem:[#allocation21_spill]] %s2525_s1 }
   0x3   :  { %10 = vsyncpa [#allocation4], 0 }
   0x4   :  { %11 = vsyncpa [#allocation7], 0 }
   0x5   :  { %13 = vsyncpa [#allocation7 + $0x1], 0 }
   0x6   :  { %14 = vsyncpa [#allocation10], 0 }
   0x7   :  { %16 = vsyncpa [#allocation10 + $0x1], 0 }
   0x8   :  { %17 = vsyncpa [#allocation5], 0  ;;  %s2093_s18 = smov 0   ;;  %s2095_s19 = smov 0  }
   0x9   :  { %s2097_s20 = smov 0   ;;  %s2099_s21 = smov 0  }
   0xa   :  { %s2101_s22 = smov 0   ;;  %s2103_s23 = smov 0  }
   0xb LB: > { %2536 = sst [smem:[#allocation16_spill]] %s2039_s20  ;;  %s32_s24 = sadd.s32 1, %s2047_s22  ;;  %s2051_s23 = sphi %s2103_s23, %s23_s23   ;;  %s2047_s22 = sphi %s2101_s22, %s2554_s22   ;;  %s2043_s21 = sphi %s2099_s21, %s2553_s21   ;;  %s2039_s20 = sphi %s2097_s20, %s2549_s20   ;;  %s2035_s19 = sphi %s2095_s19, %s2552_s19   ;;  %s2031_s18 = sphi %s2093_s18, %s2551_s18  }
   0xc   : > { %2537 = sst [smem:[#allocation17_spill]] %s2051_s23  ;;  %s68_s25 = sadd.s32 1, %s2039_s20 }
   0xd   : > { %p33_p0 = scmp.ge.s32.totalorder %s32_s24, 2  ;;  %p75_p1 = scmp.ne.s32.totalorder %s2039_s20, %s2035_s19 }
   0xe   : > { %p76_p2 = scmp.eq.s32.totalorder %s2051_s23, 0  ;;  %p1710_p4 = scmp.lt.s32.totalorder %s2051_s23, 2 }
   0xf   : > { %s2556_s24 = smov (%p33_p0, %s32_s24), 0  ;;  %s224_s28 = sand.u32 1, %s2051_s23  }
  0x10   : > { %2538 = sst [smem:[#allocation18_spill]] %s2556_s24  ;;  %p2130_p3 = por %p76_p2, %p75_p1 }
  0x11   : > { %s65_s27 = ssub.s32 %s2047_s22, %s2556_s24  ;;  %s2139_s29 = sand.u32 1, %s2039_s20  }
  0x12   : > { %p66_p5 = scmp.eq.s32.totalorder %s65_s27, 0  ;;  %s1639_s30 = sshll.u32 %s2047_s22, 3 }
  0x13   : > { %s2530_s7 = sshll.u32 %s2139_s29, 7  ;;  %s2541_s1 = sld [smem:[#allocation21_spill]] }
  0x14   : > { %s2143_s6 = scalar_select %p66_p5, %s2039_s20, %s68_s25  }
  0x15   : > { %s228_s12 = scalar_lea.vmem [#allocation6], %s2530_s7  ;;  %p2155_p6 = pnand %p1710_p4, %p2130_p3 }
  0x16   : > { %2540 = sst [smem:[#allocation19_spill]] %s2143_s6  ;;  %s236_s13 = sshll.u32 %s228_s12, 4  ;;  %s237_s13 = int_to_ptr.vmem [resolvable:$true] %s236_s13 }
  0x17   : > { %s2159_s15 = scalar_lea.sflag [#allocation7], %s224_s28  ;;  %s2053_s16 = smov 256  }
  0x18   : > { %s2054_s17 = smov 128   ;;  %s2055_s25 = smov 8  }
  0x19   : > { %s233_s10 = scalar_lea.hbm %s2541_s1, %s1639_s30  ;;  %s2165_s27 = sadd.s32 4294967295, %s2051_s23  }
  0x1a   : > { %s234_s11 = sshll.u32 %s233_s10, 4  ;;  %p81_p7 = scmp.ne.s32.totalorder %s2035_s19, %s2031_s18  ;;  %s235_s11 = int_to_ptr.hbm [resolvable:$true] %s234_s11 }
  0x1b   : > { %1702 = dma.hbm_to_vmem [thread:$0]  (!%p2155_p6), %s235_s11, 2048, %s237_s13, %s2159_s15, %s2053_s16, %s2054_s17, %s2055_s25  }
  0x1c   : > { %p82_p8 = scmp.eq.s32.totalorder %s2165_s27, 0  ;;  %p1457_p9 = scmp.ge.s32.totalorder %s2051_s23, 1 }
  0x1d   : > { %p191_p10 = scmp.lt.s32.totalorder %s2051_s23, 3  ;;  %s2544_s0 = sld [smem:[#allocation20_spill]] }
  0x1e   : > { %p2174_p11 = por %p82_p8, %p81_p7  ;;  %s2056_s18 = smov [#allocation3]  }
  0x1f   : > { %p2181_p12 = pnand %p1457_p9, %p191_p10  ;;  %s207_s10 = sshll.u32 %s2056_s18, 4  ;;  %s208_s10 = int_to_ptr.vmem [resolvable:$true] %s207_s10 }
  0x20   : > { %s1463_s11 = sshll.u32 %s2139_s29, 1  ;;  %s1464_s12 = sshll.u32 %s2047_s22, 1 }
  0x21   : > { %p1695_p13 = pneg %p2181_p12  ;;  %s254_s17 = scalar_lea.hbm %s2526_s2, %s1464_s12 }
  0x22   : > { %s2057_s25 = smov 64   ;;  %s2058_s28 = smov 4  }
  0x23   : > { %s205_s8 = sshll.u32 %s2544_s0, 4  ;;  %p1696_p0 = pnand %p1695_p13, %p82_p8  ;;  %s206_s8 = int_to_ptr.hbm [resolvable:$true] %s205_s8 }
  0x24   : > { %s256_s30 = sshll.u32 %s254_s17, 4  ;;  %s250_s7 = scalar_lea.vmem [#allocation8], %s1463_s11  ;;  %s257_s30 = int_to_ptr.hbm [resolvable:$true] %s256_s30 }
  0x25   : > { %1698 = dma.hbm_to_vmem [thread:$0]  (!%p1696_p0), %s206_s8, 1088, %s208_s10, [#allocation4], %s2057_s25, %s2057_s25, %s2058_s28  }
  0x26   : > { %s258_s0 = sshll.u32 %s250_s7, 4  ;;  %s1640_s18 = sshll.u32 %s2047_s22, 7  ;;  %s259_s0 = int_to_ptr.vmem [resolvable:$true] %s258_s0 }
  0x27   : > { %1705 = dma.hbm_to_vmem [thread:$0]  (!%p2155_p6), %s257_s30, 32, %s259_s0, %s2159_s15  }
  0x28   : > { %s2546_s1 = sshll.u32 %s2139_s29, 7  ;;  %s274_s12 = scalar_lea.hbm %s2527_s3, %s1640_s18 }
  0x29   : > { %s269_s24 = scalar_lea.vmem [#allocation9], %s2546_s1  ;;  %s275_s13 = sshll.u32 %s274_s12, 4  ;;  %s276_s13 = int_to_ptr.hbm [resolvable:$true] %s275_s13 }
  0x2a   : > { %s277_s6 = sshll.u32 %s269_s24, 4  ;;  %s266_s16 = scalar_lea.sflag [#allocation10], %s2139_s29  ;;  %s278_s6 = int_to_ptr.vmem [resolvable:$true] %s277_s6 }
  0x2b   : > { %1708 = dma.hbm_to_vmem [thread:$0]  (!%p2155_p6), %s276_s13, 2048, %s278_s6, %s266_s16, %s2057_s25, %s2057_s25, %s2058_s28  }
  0x2c   : > { %289 = sbr.rel (%p2181_p12) target bundleno = 571 (0x23b), region = 40 }
  0x31   : > { %2014 = dma.done.wait (%p82_p8), [#allocation4], 1088  }
  0x32   : > { %2016 = vsyncadd (%p82_p8), [#allocation4], 4294966208  ;;  %s296_s0 = sand.u32 1, %s2165_s27   ;;  %s298_s1 = sand.u32 1, %s2035_s19  }
  0x33   : > { %s1470_s20 = sshll.u32 %s298_s1, 7  ;;  %s297_s23 = scalar_lea.sflag [#allocation7], %s296_s0 }
  0x34   : > { %s2214_s24 = scalar_lea.vmem [#allocation6], %s1470_s20 }
  0x35   : > { %2018 = dma.done.wait (%p2174_p11), %s297_s23, 2080  }
  0x36   : > { %2020 = vsyncadd (%p2174_p11), %s297_s23, 4294965216  ;;  %s1471_s29 = sshll.u32 %s298_s1, 1  ;;  %s317_s7 = scalar_lea.sflag [#allocation10], %s298_s1 }
  0x37   : > { %s2220_s6 = scalar_lea.vmem [#allocation8], %s1471_s29  ;;  %s2222_s14 = scalar_lea.vmem [#allocation9], %s1470_s20 }
  0x38   : > { %2022 = dma.done.wait (%p2174_p11), %s317_s7, 2048  }
  0x39   : > { %2024 = vsyncadd (%p2174_p11), %s317_s7, 4294965248  ;;  %p1473_p1 = scmp.ne.s32.totalorder %s2043_s21, 0 }
  0x3b   : > { %361 = sbr.rel (%p1473_p1) target bundleno = 82 (0x52), region = 60 }
  0x40   : > { %v2059_v0 = vmov 0.0  }
  0x41   : > { %362 = vst [vmem:[#allocation2] sm:$0xff] %v2059_v0 }
  0x42   : > { %363 = vst [vmem:[#allocation2 + $0x38] sm:$0xff] %v2059_v0 }
  0x43   : > { %364 = vst [vmem:[#allocation2 + $0x78] sm:$0xff] %v2059_v0 }
  0x44   : > { %365 = vst [vmem:[#allocation2 + $0x58] sm:$0xff] %v2059_v0 }
  0x45   : > { %366 = vst [vmem:[#allocation2 + $0x20] sm:$0xff] %v2059_v0 }
  0x46   : > { %367 = vst [vmem:[#allocation2 + $0x8] sm:$0xff] %v2059_v0 }
  0x47   : > { %368 = vst [vmem:[#allocation2 + $0x70] sm:$0xff] %v2059_v0 }
  0x48   : > { %369 = vst [vmem:[#allocation2 + $0x80] sm:$0xff] %v2059_v0 }
  0x49   : > { %370 = vst [vmem:[#allocation2 + $0x28] sm:$0xff] %v2059_v0 }
  0x4a   : > { %371 = vst [vmem:[#allocation2 + $0x48] sm:$0xff] %v2059_v0 }
  0x4b   : > { %372 = vst [vmem:[#allocation2 + $0x10] sm:$0xff] %v2059_v0 }
  0x4c   : > { %373 = vst [vmem:[#allocation2 + $0x30] sm:$0xff] %v2059_v0 }
  0x4d   : > { %374 = vst [vmem:[#allocation2 + $0x40] sm:$0xff] %v2059_v0 }
  0x4e   : > { %375 = vst [vmem:[#allocation2 + $0x68] sm:$0xff] %v2059_v0 }
  0x4f   : > { %376 = vst [vmem:[#allocation2 + $0x50] sm:$0xff] %v2059_v0 }
  0x50   : > { %377 = vst [vmem:[#allocation2 + $0x60] sm:$0xff] %v2059_v0 }
  0x51   : > { %378 = vst [vmem:[#allocation2 + $0x18] sm:$0xff] %v2059_v0 }
  0x52 PF: > { %v1564_v1 = vld [vmem:[%s2214_s24 + $0x70] sm:$0xf]  ;;  %v1664_v2 = vld [vmem:[%s2214_s24 + $0x74] sm:$0xf0]  ;;  %v1663_v3 = vld [vmem:[%s2214_s24 + $0x74] sm:$0xf] }
  0x53   : > { %v1565_v4 = vor.u32 %v1664_v2, %v1564_v1  ;;  %v1566_v5 = vld [vmem:[%s2214_s24 + $0x78] sm:$0xf0]  ;;  %v1556_v6 = vld [vmem:[%s2214_s24 + $0x60] sm:$0xf]  ;;  %v1662_v7 = vld [vmem:[%s2214_s24 + $0x64] sm:$0xf0] }
  0x54   : > { %v1569_v8 = vor.u32 %v1663_v3, %v1566_v5  ;;  %v1661_v9 = vld [vmem:[%s2214_s24 + $0x64] sm:$0xf]  ;;  %v1558_v10 = vld [vmem:[%s2214_s24 + $0x68] sm:$0xf0]  ;;  %v1557_v11 = vor.u32 %v1662_v7, %v1556_v6  ;;  %v1548_v13 = vld [vmem:[%s2214_s24 + $0x50] sm:$0xf] }
  0x55   : > { %550 = vmatpush.bf16.msra.mxu0 %v1565_v4  ;;  %v1561_v12 = vor.u32 %v1661_v9, %v1558_v10  ;;  %v1660_v14 = vld [vmem:[%s2214_s24 + $0x54] sm:$0xf0]  ;;  %v1659_v15 = vld [vmem:[%s2214_s24 + $0x54] sm:$0xf]  ;;  %v1550_v16 = vld [vmem:[%s2214_s24 + $0x58] sm:$0xf0] }
  0x56   : > { %603 = vmatpush.bf16.msra.mxu1 %v1569_v8  ;;  %v1549_v17 = vor.u32 %v1660_v14, %v1548_v13  ;;  %v1553_v18 = vor.u32 %v1659_v15, %v1550_v16  ;;  %v1540_v19 = vld [vmem:[%s2214_s24 + $0x40] sm:$0xf]  ;;  %v1658_v20 = vld [vmem:[%s2214_s24 + $0x44] sm:$0xf0]  ;;  %v1657_v21 = vld [vmem:[%s2214_s24 + $0x44] sm:$0xf] }
  0x57   : > { %v1542_v22 = vld [vmem:[%s2214_s24 + $0x48] sm:$0xf0]  ;;  %v1541_v23 = vor.u32 %v1658_v20, %v1540_v19  ;;  %v1532_v25 = vld [vmem:[%s2214_s24 + $0x30] sm:$0xf]  ;;  %v1656_v26 = vld [vmem:[%s2214_s24 + $0x34] sm:$0xf0] }
  0x58   : > { %v1545_v24 = vor.u32 %v1657_v21, %v1542_v22  ;;  %v1655_v27 = vld [vmem:[%s2214_s24 + $0x34] sm:$0xf]  ;;  %v1534_v28 = vld [vmem:[%s2214_s24 + $0x38] sm:$0xf0]  ;;  %v1533_v29 = vor.u32 %v1656_v26, %v1532_v25  ;;  %v1524_v31 = vld [vmem:[%s2214_s24 + $0x20] sm:$0xf] }
  0x59   : > { %551 = vmatpush.bf16.msra.mxu0 %v1557_v11  ;;  %v1537_v30 = vor.u32 %v1655_v27, %v1534_v28  ;;  %v1654_v32 = vld [vmem:[%s2214_s24 + $0x24] sm:$0xf0]  ;;  %v1653_v33 = vld [vmem:[%s2214_s24 + $0x24] sm:$0xf]  ;;  %v1526_v34 = vld [vmem:[%s2214_s24 + $0x28] sm:$0xf0] }
  0x5a   : > { %604 = vmatpush.bf16.msra.mxu1 %v1561_v12  ;;  %v1525_v35 = vor.u32 %v1654_v32, %v1524_v31  ;;  %v1529_v36 = vor.u32 %v1653_v33, %v1526_v34  ;;  %v1516_v37 = vld [vmem:[%s2214_s24 + $0x10] sm:$0xf]  ;;  %v1652_v38 = vld [vmem:[%s2214_s24 + $0x14] sm:$0xf0]  ;;  %v1651_v39 = vld [vmem:[%s2214_s24 + $0x14] sm:$0xf] }
  0x5b   : > { %v1518_v40 = vld [vmem:[%s2214_s24 + $0x18] sm:$0xf0]  ;;  %v1517_v41 = vor.u32 %v1652_v38, %v1516_v37  ;;  %v1508_v43 = vld [vmem:[%s2214_s24] sm:$0xf]  ;;  %v1650_v44 = vld [vmem:[%s2214_s24 + $0x4] sm:$0xf0] }
  0x5c   : > { %v1521_v42 = vor.u32 %v1651_v39, %v1518_v40  ;;  %v1649_v45 = vld [vmem:[%s2214_s24 + $0x4] sm:$0xf]  ;;  %v1510_v46 = vld [vmem:[%s2214_s24 + $0x8] sm:$0xf0]  ;;  %v1509_v47 = vor.u32 %v1650_v44, %v1508_v43  ;;  %v1641_v49 = vld [vmem:[#allocation3] sm:$0xff]  ;;  %p1634_p2 = scmp.ne.s32.totalorder %s2043_s21, 1 }
  0x5d   : > { %552 = vmatpush.bf16.msra.mxu0 %v1549_v17  ;;  %v1513_v48 = vor.u32 %v1649_v45, %v1510_v46  ;;  %v1642_v50 = vld [vmem:[#allocation3 + $0x8] sm:$0xff]  ;;  %v1643_v51 = vld [vmem:[#allocation3 + $0x10] sm:$0xff]  ;;  %v1644_v52 = vld [vmem:[#allocation3 + $0x18] sm:$0xff] }
  0x5e   : > { %605 = vmatpush.bf16.msra.mxu1 %v1553_v18  ;;  %v1645_v53 = vld [vmem:[#allocation3 + $0x20] sm:$0xff]  ;;  %v1646_v54 = vld [vmem:[#allocation3 + $0x28] sm:$0xff]  ;;  %v1647_v55 = vld [vmem:[#allocation3 + $0x30] sm:$0xff] }
  0x5f   : > { %v1672_v56 = vld [vmem:[%s2222_s14 + $0x38] sm:$0xff]  ;;  %v1671_v58 = vld [vmem:[%s2222_s14 + $0x30] sm:$0xff]  ;;  %v1670_v60 = vld [vmem:[%s2222_s14 + $0x28] sm:$0xff] }
  0x60   : > { %v1680_v57 = vld [vmem:[%s2222_s14 + $0x78] sm:$0xff]  ;;  %1125 = vmatpush.bf16.msra.mxu2 %v1672_v56  ;;  %v1679_v59 = vld [vmem:[%s2222_s14 + $0x70] sm:$0xff]  ;;  %v1678_v61 = vld [vmem:[%s2222_s14 + $0x68] sm:$0xff] }
  0x61   : > { %553 = vmatpush.bf16.msra.mxu0 %v1541_v23  ;;  %1178 = vmatpush.bf16.msra.mxu3 %v1680_v57  ;;  %v1669_v62 = vld [vmem:[%s2222_s14 + $0x20] sm:$0xff]  ;;  %v1648_v0 = vld [vmem:[#allocation3 + $0x38] sm:$0xff]  ;;  %v1668_v1 = vld [vmem:[%s2222_s14 + $0x18] sm:$0xff] }
  0x62   : > { %606 = vmatpush.bf16.msra.mxu1 %v1545_v24  ;;  %v1677_v63 = vld [vmem:[%s2222_s14 + $0x60] sm:$0xff]  ;;  %v1676_v2 = vld [vmem:[%s2222_s14 + $0x58] sm:$0xff]  ;;  %v1667_v3 = vld [vmem:[%s2222_s14 + $0x10] sm:$0xff] }
  0x63   : > { %v1675_v4 = vld [vmem:[%s2222_s14 + $0x50] sm:$0xff]  ;;  %v395_v5 = vld [vmem:[#allocation3 + $0x40] sm:$0xf]  ;;  %v412_v6 = vld [vmem:[%s2220_s6] sm:$0x3] }
  0x64   : > { %1126 = vmatpush.bf16.msra.mxu2 %v1671_v58  ;;  %v1666_v7 = vld [vmem:[%s2222_s14 + $0x8] sm:$0xff]  ;;  %v451_v9 = vunpack.c.l.b16 %v395_v5  ;;  %v1665_v10 = vld [vmem:[%s2222_s14] sm:$0xff]  ;;  %v2277_v11 = vperm.slane %v412_v6, 0  ;;  %v2280_v13 = vperm.slane %v412_v6, 1 }
  0x65   : > { %554 = vmatpush.bf16.msra.mxu0 %v1533_v29  ;;  %1179 = vmatpush.bf16.msra.mxu3 %v1679_v59  ;;  %v1674_v8 = vld [vmem:[%s2222_s14 + $0x48] sm:$0xff]  ;;  %v1673_v12 = vld [vmem:[%s2222_s14 + $0x40] sm:$0xff] }
  0x66   : > { %607 = vmatpush.bf16.msra.mxu1 %v1537_v30  ;;  %v460_v14 = vpack.c.b16 %v451_v9, %v451_v9 }
  0x68   : > { %1127 = vmatpush.bf16.msra.mxu2 %v1670_v60 }
  0x69   : > { %555 = vmatpush.bf16.msra.mxu0 %v1525_v35  ;;  %1180 = vmatpush.bf16.msra.mxu3 %v1678_v61 }
  0x6a   : > { %608 = vmatpush.bf16.msra.mxu1 %v1529_v36 }
  0x6c   : > { %1128 = vmatpush.bf16.msra.mxu2 %v1669_v62 }
  0x6d   : > { %556 = vmatpush.bf16.msra.mxu0 %v1517_v41  ;;  %1181 = vmatpush.bf16.msra.mxu3 %v1677_v63 }
  0x6e   : > { %609 = vmatpush.bf16.msra.mxu1 %v1521_v42 }
  0x70   : > { %1129 = vmatpush.bf16.msra.mxu2 %v1668_v1 }
  0x71   : > { %557 = vmatpush.bf16.msra.mxu0 %v1509_v47  ;;  %1182 = vmatpush.bf16.msra.mxu3 %v1676_v2 }
  0x72   : > { %610 = vmatpush.bf16.msra.mxu1 %v1513_v48 }
  0x74   : > { %558 = vmatmul.bf16.vlgmr.msra.gmra.mxu0 %v1641_v49  ;;  %1130 = vmatpush.bf16.msra.mxu2 %v1667_v3 }
  0x75   : > { %611 = vmatmul.bf16.vlgmr.msra.gmra.mxu1 %v1641_v49  ;;  %1183 = vmatpush.bf16.msra.mxu3 %v1675_v4 }
  0x78   : > { %1131 = vmatpush.bf16.msra.mxu2 %v1666_v7 }
  0x79   : > { %1184 = vmatpush.bf16.msra.mxu3 %v1674_v8 }
  0x7c   : > { %1132 = vmatpush.bf16.msra.mxu2 %v1665_v10 }
  0x7d   : > { %1185 = vmatpush.bf16.msra.mxu3 %v1673_v12 }
  0x84   : > { %563 = vmatmul.bf16.gmra.mxu0 %v1642_v50 }
  0x85   : > { %616 = vmatmul.bf16.gmra.mxu1 %v1642_v50 }
  0x94   : > { %568 = vmatmul.bf16.gmra.mxu0 %v1643_v51 }
  0x95   : > { %621 = vmatmul.bf16.gmra.mxu1 %v1643_v51 }
  0xa4   : > { %573 = vmatmul.bf16.gmra.mxu0 %v1644_v52 }
  0xa5   : > { %626 = vmatmul.bf16.gmra.mxu1 %v1644_v52 }
  0xb4   : > { %578 = vmatmul.bf16.gmra.mxu0 %v1645_v53 }
  0xb5   : > { %631 = vmatmul.bf16.gmra.mxu1 %v1645_v53 }
  0xc4   : > { %583 = vmatmul.bf16.gmra.mxu0 %v1646_v54 }
  0xc5   : > { %636 = vmatmul.bf16.gmra.mxu1 %v1646_v54 }
  0xd4   : > { %588 = vmatmul.bf16.gmra.mxu0 %v1647_v55 }
  0xd5   : > { %641 = vmatmul.bf16.gmra.mxu1 %v1647_v55 }
  0xe4   : > { %593 = vmatmul.bf16.gmra.mxu0 %v1648_v0 }
  0xe5   : > { %646 = vmatmul.bf16.gmra.mxu1 %v1648_v0 }
  0xf1   : > { %v559_v15 = vpop.f32.mrf.mxu0 }
  0xf2   : > { %v560_v16 = vadd.f32 %v559_v15, %v2277_v11  ;;  %v612_v17 = vpop.f32.mrf.mxu1 }
  0xf3   : > { %v613_v18 = vadd.f32 %v612_v17, %v2280_v13 }
  0xf4   : > { %v690_v19 = vmul.f32 0.044715, %v560_v16  ;;  %598 = vmatmul.bf16.gmra.mxu0 %v460_v14  ;;  %v656_v0 = vmul.f32 0.5, %v560_v16 }
  0xf5   : > { %v691_v20 = vmul.f32 0.044715, %v613_v18  ;;  %651 = vmatmul.bf16.gmra.mxu1 %v460_v14  ;;  %v657_v6 = vmul.f32 0.5, %v613_v18 }
  0xf6   : > { %v724_v21 = vmul.f32 %v690_v19, %v560_v16 }
  0xf7   : > { %v725_v22 = vmul.f32 %v691_v20, %v613_v18 }
  0xf8   : > { %v758_v23 = vmul.f32 %v724_v21, %v560_v16 }
  0xf9   : > { %v561_v24 = vpop.f32.mrf.mxu0  ;;  %v759_v25 = vmul.f32 %v725_v22, %v613_v18 }
  0xfa   : > { %v562_v26 = vadd.f32 %v561_v24, %v2277_v11  ;;  %v614_v27 = vpop.f32.mrf.mxu1  ;;  %v792_v28 = vadd.f32 %v758_v23, %v560_v16 }
  0xfb   : > { %v615_v29 = vadd.f32 %v614_v27, %v2280_v13  ;;  %v793_v30 = vadd.f32 %v759_v25, %v613_v18 }
  0xfc   : > { %v692_v31 = vmul.f32 0.044715, %v562_v26  ;;  %v826_v34 = vmul.f32 0.7978846, %v792_v28  ;;  %v658_v4 = vmul.f32 0.5, %v562_v26 }
  0xfd   : > { %v693_v32 = vmul.f32 0.044715, %v615_v29  ;;  %v827_v36 = vmul.f32 0.7978846, %v793_v30  ;;  %v659_v7 = vmul.f32 0.5, %v615_v29 }
  0xfe   : > { %v726_v33 = vmul.f32 %v692_v31, %v562_v26  ;;  %1772 = vtanh.f32 %v826_v34 }
  0xff   : > { %v727_v35 = vmul.f32 %v693_v32, %v615_v29  ;;  %1774 = vtanh.f32 %v827_v36 }
 0x100   : > { %v760_v37 = vmul.f32 %v726_v33, %v562_v26 }
 0x101   : > { %v564_v38 = vpop.f32.mrf.mxu0  ;;  %v761_v39 = vmul.f32 %v727_v35, %v615_v29 }
 0x102   : > { %v2287_v40 = vadd.f32 %v564_v38, %v2277_v11  ;;  %v617_v41 = vpop.f32.mrf.mxu1  ;;  %v794_v42 = vadd.f32 %v760_v37, %v562_v26 }
 0x103   : > { %v2290_v43 = vadd.f32 %v617_v41, %v2280_v13  ;;  %v795_v44 = vadd.f32 %v761_v39, %v615_v29 }
 0x104   : > { %v694_v45 = vmul.f32 0.044715, %v2287_v40  ;;  %v828_v46 = vmul.f32 0.7978846, %v794_v42  ;;  %v1773_v51 = vpop.eup %1772 }
 0x105   : > { %v695_v47 = vmul.f32 0.044715, %v2290_v43  ;;  %v829_v48 = vmul.f32 0.7978846, %v795_v44  ;;  %v1775_v53 = vpop.eup %1774  ;;  %v894_v60 = vadd.f32 1.0, %v1773_v51 }
 0x106   : > { %1776 = vtanh.f32 %v828_v46  ;;  %v728_v49 = vmul.f32 %v694_v45, %v2287_v40  ;;  %v895_v1 = vadd.f32 1.0, %v1775_v53 }
 0x107   : > { %1778 = vtanh.f32 %v829_v48  ;;  %v729_v50 = vmul.f32 %v695_v47, %v2290_v43  ;;  %v928_v12 = vmul.f32 %v894_v60, %v656_v0 }
 0x108   : > { %v762_v52 = vmul.f32 %v728_v49, %v2287_v40  ;;  %v929_v19 = vmul.f32 %v895_v1, %v657_v6 }
 0x109   : > { %v566_v54 = vpop.f32.mrf.mxu0  ;;  %v763_v55 = vmul.f32 %v729_v50, %v2290_v43  ;;  %v660_v50 = vmul.f32 0.5, %v2287_v40 }
 0x10a   : > { %v2299_v56 = vadd.f32 %v566_v54, %v2277_v11  ;;  %v619_v57 = vpop.f32.mrf.mxu1  ;;  %v796_v58 = vadd.f32 %v762_v52, %v2287_v40 }
 0x10b   : > { %v2303_v59 = vadd.f32 %v619_v57, %v2280_v13  ;;  %v797_v61 = vadd.f32 %v763_v55, %v2290_v43  ;;  %v661_v57 = vmul.f32 0.5, %v2290_v43 }
 0x10c   : > { %v1777_v62 = vpop.eup %1776  ;;  %v696_v63 = vmul.f32 0.044715, %v2299_v56  ;;  %v830_v10 = vmul.f32 0.7978846, %v796_v58  ;;  %v662_v54 = vmul.f32 0.5, %v2299_v56 }
 0x10d   : > { %v1779_v2 = vpop.eup %1778  ;;  %v697_v3 = vmul.f32 0.044715, %v2303_v59  ;;  %v896_v5 = vadd.f32 1.0, %v1777_v62  ;;  %v831_v17 = vmul.f32 0.7978846, %v797_v61  ;;  %v663_v58 = vmul.f32 0.5, %v2303_v59 }
 0x10e   : > { %v897_v8 = vadd.f32 1.0, %v1779_v2  ;;  %v730_v9 = vmul.f32 %v696_v63, %v2299_v56  ;;  %1780 = vtanh.f32 %v830_v10 }
 0x10f   : > { %v930_v14 = vmul.f32 %v896_v5, %v658_v4  ;;  %v731_v15 = vmul.f32 %v697_v3, %v2303_v59  ;;  %1782 = vtanh.f32 %v831_v17 }
 0x110   : > { %v931_v20 = vmul.f32 %v897_v8, %v659_v7  ;;  %v764_v16 = vmul.f32 %v730_v9, %v2299_v56 }
 0x111   : > { %v569_v21 = vpop.f32.mrf.mxu0  ;;  %v979_v22 = vpack.c.bf16 %v930_v14, %v928_v12  ;;  %v765_v23 = vmul.f32 %v731_v15, %v2303_v59 }
 0x112   : > { %v2313_v18 = vadd.f32 %v569_v21, %v2277_v11  ;;  %v622_v24 = vpop.f32.mrf.mxu1  ;;  %v980_v25 = vpack.c.bf16 %v931_v20, %v929_v19  ;;  %v798_v26 = vadd.f32 %v764_v16, %v2299_v56 }
 0x113   : > { %v2317_v27 = vadd.f32 %v622_v24, %v2280_v13  ;;  %1133 = vmatmul.bf16.vlgmr.msra.gmra.mxu2 %v979_v22  ;;  %v799_v28 = vadd.f32 %v765_v23, %v2303_v59 }
 0x114   : > { %v698_v29 = vmul.f32 0.044715, %v2313_v18  ;;  %1186 = vmatmul.bf16.vlgmr.msra.gmra.mxu3 %v980_v25  ;;  %v832_v30 = vmul.f32 0.7978846, %v798_v26  ;;  %v1781_v35 = vpop.eup %1780 }
 0x115   : > { %v699_v31 = vmul.f32 0.044715, %v2317_v27  ;;  %v833_v32 = vmul.f32 0.7978846, %v799_v28  ;;  %v1783_v37 = vpop.eup %1782  ;;  %v898_v46 = vadd.f32 1.0, %v1781_v35 }
 0x116   : > { %1784 = vtanh.f32 %v832_v30  ;;  %v732_v33 = vmul.f32 %v698_v29, %v2313_v18  ;;  %v899_v51 = vadd.f32 1.0, %v1783_v37 }
 0x117   : > { %1786 = vtanh.f32 %v833_v32  ;;  %v733_v34 = vmul.f32 %v699_v31, %v2317_v27  ;;  %v932_v63 = vmul.f32 %v898_v46, %v660_v50 }
 0x118   : > { %v766_v36 = vmul.f32 %v732_v33, %v2313_v18  ;;  %v933_v2 = vmul.f32 %v899_v51, %v661_v57 }
 0x119   : > { %v571_v38 = vpop.f32.mrf.mxu0  ;;  %v767_v39 = vmul.f32 %v733_v34, %v2317_v27  ;;  %v664_v34 = vmul.f32 0.5, %v2313_v18 }
 0x11a   : > { %v2327_v41 = vadd.f32 %v571_v38, %v2277_v11  ;;  %v624_v42 = vpop.f32.mrf.mxu1  ;;  %v800_v44 = vadd.f32 %v766_v36, %v2313_v18 }
 0x11b   : > { %v2331_v45 = vadd.f32 %v624_v42, %v2280_v13  ;;  %v801_v47 = vadd.f32 %v767_v39, %v2317_v27  ;;  %v665_v42 = vmul.f32 0.5, %v2317_v27 }
 0x11c   : > { %v1785_v48 = vpop.eup %1784  ;;  %v700_v49 = vmul.f32 0.044715, %v2327_v41  ;;  %v834_v62 = vmul.f32 0.7978846, %v800_v44  ;;  %v666_v38 = vmul.f32 0.5, %v2327_v41 }
 0x11d   : > { %v1787_v52 = vpop.eup %1786  ;;  %v701_v53 = vmul.f32 0.044715, %v2331_v45  ;;  %v900_v55 = vadd.f32 1.0, %v1785_v48  ;;  %v835_v40 = vmul.f32 0.7978846, %v801_v47  ;;  %v667_v44 = vmul.f32 0.5, %v2331_v45 }
 0x11e   : > { %v901_v60 = vadd.f32 1.0, %v1787_v52  ;;  %v734_v61 = vmul.f32 %v700_v49, %v2327_v41  ;;  %1788 = vtanh.f32 %v834_v62 }
 0x11f   : > { %v934_v0 = vmul.f32 %v900_v55, %v662_v54  ;;  %v735_v1 = vmul.f32 %v701_v53, %v2331_v45  ;;  %1790 = vtanh.f32 %v835_v40 }
 0x120   : > { %v935_v3 = vmul.f32 %v901_v60, %v663_v58  ;;  %v768_v4 = vmul.f32 %v734_v61, %v2327_v41 }
 0x121   : > { %v574_v5 = vpop.f32.mrf.mxu0  ;;  %v981_v56 = vpack.c.bf16 %v934_v0, %v932_v63  ;;  %v769_v6 = vmul.f32 %v735_v1, %v2331_v45 }
 0x122   : > { %v2345_v43 = vadd.f32 %v574_v5, %v2277_v11  ;;  %v627_v59 = vpop.f32.mrf.mxu1  ;;  %v982_v7 = vpack.c.bf16 %v935_v3, %v933_v2  ;;  %v802_v8 = vadd.f32 %v768_v4, %v2327_v41 }
 0x123   : > { %v2349_v9 = vadd.f32 %v627_v59, %v2280_v13  ;;  %1138 = vmatmul.bf16.gmra.mxu2 %v981_v56  ;;  %v803_v10 = vadd.f32 %v769_v6, %v2331_v45 }
 0x124   : > { %v702_v12 = vmul.f32 0.044715, %v2345_v43  ;;  %1191 = vmatmul.bf16.gmra.mxu3 %v982_v7  ;;  %v836_v14 = vmul.f32 0.7978846, %v802_v8  ;;  %v1789_v16 = vpop.eup %1788 }
 0x125   : > { %v703_v15 = vmul.f32 0.044715, %v2349_v9  ;;  %v837_v17 = vmul.f32 0.7978846, %v803_v10  ;;  %v1791_v22 = vpop.eup %1790  ;;  %v902_v30 = vadd.f32 1.0, %v1789_v16 }
 0x126   : > { %1792 = vtanh.f32 %v836_v14  ;;  %v736_v19 = vmul.f32 %v702_v12, %v2345_v43  ;;  %v903_v35 = vadd.f32 1.0, %v1791_v22 }
 0x127   : > { %1794 = vtanh.f32 %v837_v17  ;;  %v737_v20 = vmul.f32 %v703_v15, %v2349_v9  ;;  %v936_v49 = vmul.f32 %v902_v30, %v664_v34 }
 0x128   : > { %v770_v21 = vmul.f32 %v736_v19, %v2345_v43  ;;  %v937_v52 = vmul.f32 %v903_v35, %v665_v42 }
 0x129   : > { %v576_v23 = vpop.f32.mrf.mxu0  ;;  %v771_v24 = vmul.f32 %v737_v20, %v2349_v9  ;;  %v668_v20 = vmul.f32 0.5, %v2345_v43 }
 0x12a   : > { %v2359_v25 = vadd.f32 %v576_v23, %v2277_v11  ;;  %v629_v26 = vpop.f32.mrf.mxu1  ;;  %v804_v28 = vadd.f32 %v770_v21, %v2345_v43 }
 0x12b   : > { %v2363_v29 = vadd.f32 %v629_v26, %v2280_v13  ;;  %v805_v31 = vadd.f32 %v771_v24, %v2349_v9  ;;  %v669_v26 = vmul.f32 0.5, %v2349_v9 }
 0x12c   : > { %v1793_v32 = vpop.eup %1792  ;;  %v704_v33 = vmul.f32 0.044715, %v2359_v25  ;;  %v838_v48 = vmul.f32 0.7978846, %v804_v28  ;;  %v670_v23 = vmul.f32 0.5, %v2359_v25 }
 0x12d   : > { %v1795_v36 = vpop.eup %1794  ;;  %v705_v37 = vmul.f32 0.044715, %v2363_v29  ;;  %v904_v39 = vadd.f32 1.0, %v1793_v32  ;;  %v839_v18 = vmul.f32 0.7978846, %v805_v31  ;;  %v671_v28 = vmul.f32 0.5, %v2363_v29 }
 0x12e   : > { %v905_v46 = vadd.f32 1.0, %v1795_v36  ;;  %v738_v47 = vmul.f32 %v704_v33, %v2359_v25  ;;  %1796 = vtanh.f32 %v838_v48 }
 0x12f   : > { %v938_v50 = vmul.f32 %v904_v39, %v666_v38  ;;  %v739_v51 = vmul.f32 %v705_v37, %v2363_v29  ;;  %1798 = vtanh.f32 %v839_v18 }
 0x130   : > { %v939_v53 = vmul.f32 %v905_v46, %v667_v44  ;;  %v772_v54 = vmul.f32 %v738_v47, %v2359_v25 }
 0x131   : > { %v579_v55 = vpop.f32.mrf.mxu0  ;;  %v983_v41 = vpack.c.bf16 %v938_v50, %v936_v49  ;;  %v773_v57 = vmul.f32 %v739_v51, %v2363_v29 }
 0x132   : > { %v2377_v27 = vadd.f32 %v579_v55, %v2277_v11  ;;  %v632_v45 = vpop.f32.mrf.mxu1  ;;  %v984_v58 = vpack.c.bf16 %v939_v53, %v937_v52  ;;  %v806_v60 = vadd.f32 %v772_v54, %v2359_v25 }
 0x133   : > { %v2381_v61 = vadd.f32 %v632_v45, %v2280_v13  ;;  %1143 = vmatmul.bf16.gmra.mxu2 %v983_v41  ;;  %v807_v62 = vadd.f32 %v773_v57, %v2363_v29 }
 0x134   : > { %v706_v63 = vmul.f32 0.044715, %v2377_v27  ;;  %1196 = vmatmul.bf16.gmra.mxu3 %v984_v58  ;;  %v840_v0 = vmul.f32 0.7978846, %v806_v60  ;;  %v1797_v4 = vpop.eup %1796 }
 0x135   : > { %v707_v1 = vmul.f32 0.044715, %v2381_v61  ;;  %v841_v40 = vmul.f32 0.7978846, %v807_v62  ;;  %v1799_v56 = vpop.eup %1798  ;;  %v906_v14 = vadd.f32 1.0, %v1797_v4 }
 0x136   : > { %1800 = vtanh.f32 %v840_v0  ;;  %v740_v2 = vmul.f32 %v706_v63, %v2377_v27  ;;  %v907_v16 = vadd.f32 1.0, %v1799_v56 }
 0x137   : > { %1802 = vtanh.f32 %v841_v40  ;;  %v741_v3 = vmul.f32 %v707_v1, %v2381_v61  ;;  %v940_v33 = vmul.f32 %v906_v14, %v668_v20 }
 0x138   : > { %v774_v5 = vmul.f32 %v740_v2, %v2377_v27  ;;  %v941_v36 = vmul.f32 %v907_v16, %v669_v26 }
 0x139   : > { %v581_v6 = vpop.f32.mrf.mxu0  ;;  %v775_v59 = vmul.f32 %v741_v3, %v2381_v61  ;;  %v672_v3 = vmul.f32 0.5, %v2377_v27 }
 0x13a   : > { %v2391_v7 = vadd.f32 %v581_v6, %v2277_v11  ;;  %v634_v8 = vpop.f32.mrf.mxu1  ;;  %v808_v10 = vadd.f32 %v774_v5, %v2377_v27 }
 0x13b   : > { %v2395_v12 = vadd.f32 %v634_v8, %v2280_v13  ;;  %v809_v15 = vadd.f32 %v775_v59, %v2381_v61  ;;  %v673_v8 = vmul.f32 0.5, %v2381_v61 }
 0x13c   : > { %v1801_v17 = vpop.eup %1800  ;;  %v708_v19 = vmul.f32 0.044715, %v2391_v7  ;;  %v842_v32 = vmul.f32 0.7978846, %v808_v10  ;;  %v674_v6 = vmul.f32 0.5, %v2391_v7 }
 0x13d   : > { %v1803_v21 = vpop.eup %1802  ;;  %v709_v22 = vmul.f32 0.044715, %v2395_v12  ;;  %v908_v24 = vadd.f32 1.0, %v1801_v17  ;;  %v843_v43 = vmul.f32 0.7978846, %v809_v15  ;;  %v675_v10 = vmul.f32 0.5, %v2395_v12 }
 0x13e   : > { %v909_v30 = vadd.f32 1.0, %v1803_v21  ;;  %v742_v31 = vmul.f32 %v708_v19, %v2391_v7  ;;  %1804 = vtanh.f32 %v842_v32 }
 0x13f   : > { %v942_v34 = vmul.f32 %v908_v24, %v670_v23  ;;  %v743_v35 = vmul.f32 %v709_v22, %v2395_v12  ;;  %1806 = vtanh.f32 %v843_v43 }
 0x140   : > { %v943_v37 = vmul.f32 %v909_v30, %v671_v28  ;;  %v776_v38 = vmul.f32 %v742_v31, %v2391_v7 }
 0x141   : > { %v584_v39 = vpop.f32.mrf.mxu0  ;;  %v985_v25 = vpack.c.bf16 %v942_v34, %v940_v33  ;;  %v777_v42 = vmul.f32 %v743_v35, %v2395_v12 }
 0x142   : > { %v2409_v9 = vadd.f32 %v584_v39, %v2277_v11  ;;  %v637_v29 = vpop.f32.mrf.mxu1  ;;  %v986_v44 = vpack.c.bf16 %v943_v37, %v941_v36  ;;  %v810_v46 = vadd.f32 %v776_v38, %v2391_v7 }
 0x143   : > { %v2413_v47 = vadd.f32 %v637_v29, %v2280_v13  ;;  %1148 = vmatmul.bf16.gmra.mxu2 %v985_v25  ;;  %v811_v48 = vadd.f32 %v777_v42, %v2395_v12 }
 0x144   : > { %v710_v49 = vmul.f32 0.044715, %v2409_v9  ;;  %1201 = vmatmul.bf16.gmra.mxu3 %v986_v44  ;;  %v844_v50 = vmul.f32 0.7978846, %v810_v46  ;;  %v1805_v54 = vpop.eup %1804 }
 0x145   : > { %v711_v51 = vmul.f32 0.044715, %v2413_v47  ;;  %v845_v18 = vmul.f32 0.7978846, %v811_v48  ;;  %v1807_v41 = vpop.eup %1806  ;;  %v910_v0 = vadd.f32 1.0, %v1805_v54 }
 0x146   : > { %1808 = vtanh.f32 %v844_v50  ;;  %v744_v52 = vmul.f32 %v710_v49, %v2409_v9  ;;  %v911_v4 = vadd.f32 1.0, %v1807_v41 }
 0x147   : > { %1810 = vtanh.f32 %v845_v18  ;;  %v745_v53 = vmul.f32 %v711_v51, %v2413_v47  ;;  %v944_v19 = vmul.f32 %v910_v0, %v672_v3 }
 0x148   : > { %v778_v55 = vmul.f32 %v744_v52, %v2409_v9  ;;  %v945_v21 = vmul.f32 %v911_v4, %v673_v8 }
 0x149   : > { %v586_v57 = vpop.f32.mrf.mxu0  ;;  %v779_v45 = vmul.f32 %v745_v53, %v2413_v47  ;;  %v676_v53 = vmul.f32 0.5, %v2409_v9 }
 0x14a   : > { %v2423_v58 = vadd.f32 %v586_v57, %v2277_v11  ;;  %v639_v60 = vpop.f32.mrf.mxu1  ;;  %v812_v62 = vadd.f32 %v778_v55, %v2409_v9 }
 0x14b   : > { %v2427_v63 = vadd.f32 %v639_v60, %v2280_v13  ;;  %v813_v1 = vadd.f32 %v779_v45, %v2413_v47  ;;  %v677_v60 = vmul.f32 0.5, %v2413_v47 }
 0x14c   : > { %v1809_v40 = vpop.eup %1808  ;;  %v712_v2 = vmul.f32 0.044715, %v2423_v58  ;;  %v846_v17 = vmul.f32 0.7978846, %v812_v62  ;;  %v678_v57 = vmul.f32 0.5, %v2423_v58 }
 0x14d   : > { %v1811_v5 = vpop.eup %1810  ;;  %v713_v56 = vmul.f32 0.044715, %v2427_v63  ;;  %v912_v59 = vadd.f32 1.0, %v1809_v40  ;;  %v847_v27 = vmul.f32 0.7978846, %v813_v1  ;;  %v679_v62 = vmul.f32 0.5, %v2427_v63 }
 0x14e   : > { %v913_v14 = vadd.f32 1.0, %v1811_v5  ;;  %v746_v15 = vmul.f32 %v712_v2, %v2423_v58  ;;  %1812 = vtanh.f32 %v846_v17 }
 0x14f   : > { %v946_v20 = vmul.f32 %v912_v59, %v674_v6  ;;  %v747_v16 = vmul.f32 %v713_v56, %v2427_v63  ;;  %1814 = vtanh.f32 %v847_v27 }
 0x150   : > { %v947_v22 = vmul.f32 %v913_v14, %v675_v10  ;;  %v780_v23 = vmul.f32 %v746_v15, %v2423_v58 }
 0x151   : > { %v589_v24 = vpop.f32.mrf.mxu0  ;;  %v987_v7 = vpack.c.bf16 %v946_v20, %v944_v19  ;;  %v781_v26 = vmul.f32 %v747_v16, %v2427_v63 }
 0x152   : > { %v2441_v61 = vadd.f32 %v589_v24, %v2277_v11  ;;  %v642_v12 = vpop.f32.mrf.mxu1  ;;  %v988_v28 = vpack.c.bf16 %v947_v22, %v945_v21  ;;  %v814_v30 = vadd.f32 %v780_v23, %v2423_v58 }
 0x153   : > { %v2445_v31 = vadd.f32 %v642_v12, %v2280_v13  ;;  %1153 = vmatmul.bf16.gmra.mxu2 %v987_v7  ;;  %v815_v32 = vadd.f32 %v781_v26, %v2427_v63 }
 0x154   : > { %v714_v33 = vmul.f32 0.044715, %v2441_v61  ;;  %1206 = vmatmul.bf16.gmra.mxu3 %v988_v28  ;;  %v848_v34 = vmul.f32 0.7978846, %v814_v30  ;;  %v1813_v38 = vpop.eup %1812 }
 0x155   : > { %v715_v35 = vmul.f32 0.044715, %v2445_v31  ;;  %v849_v43 = vmul.f32 0.7978846, %v815_v32  ;;  %v1815_v25 = vpop.eup %1814  ;;  %v914_v50 = vadd.f32 1.0, %v1813_v38 }
 0x156   : > { %1816 = vtanh.f32 %v848_v34  ;;  %v748_v36 = vmul.f32 %v714_v33, %v2441_v61  ;;  %v915_v54 = vadd.f32 1.0, %v1815_v25 }
 0x157   : > { %1818 = vtanh.f32 %v849_v43  ;;  %v749_v37 = vmul.f32 %v715_v35, %v2445_v31  ;;  %v948_v2 = vmul.f32 %v914_v50, %v676_v53 }
 0x158   : > { %v782_v39 = vmul.f32 %v748_v36, %v2441_v61  ;;  %v949_v5 = vmul.f32 %v915_v54, %v677_v60 }
 0x159   : > { %v591_v42 = vpop.f32.mrf.mxu0  ;;  %v783_v29 = vmul.f32 %v749_v37, %v2445_v31  ;;  %v680_v37 = vmul.f32 0.5, %v2441_v61 }
 0x15a   : > { %v2455_v44 = vadd.f32 %v591_v42, %v2277_v11  ;;  %v644_v46 = vpop.f32.mrf.mxu1  ;;  %v816_v48 = vadd.f32 %v782_v39, %v2441_v61 }
 0x15b   : > { %v2459_v49 = vadd.f32 %v644_v46, %v2280_v13  ;;  %v817_v51 = vadd.f32 %v783_v29, %v2445_v31  ;;  %v681_v46 = vmul.f32 0.5, %v2445_v31 }
 0x15c   : > { %v1817_v18 = vpop.eup %1816  ;;  %v716_v52 = vmul.f32 0.044715, %v2455_v44  ;;  %v850_v40 = vmul.f32 0.7978846, %v816_v48  ;;  %v682_v42 = vmul.f32 0.5, %v2455_v44 }
 0x15d   : > { %v1819_v55 = vpop.eup %1818  ;;  %v717_v41 = vmul.f32 0.044715, %v2459_v49  ;;  %v916_v45 = vadd.f32 1.0, %v1817_v18  ;;  %v851_v9 = vmul.f32 0.7978846, %v817_v51  ;;  %v683_v48 = vmul.f32 0.5, %v2459_v49 }
 0x15e   : > { %v917_v0 = vadd.f32 1.0, %v1819_v55  ;;  %v750_v1 = vmul.f32 %v716_v52, %v2455_v44  ;;  %1820 = vtanh.f32 %v850_v40 }
 0x15f   : > { %v950_v3 = vmul.f32 %v916_v45, %v678_v57  ;;  %v751_v4 = vmul.f32 %v717_v41, %v2459_v49  ;;  %1822 = vtanh.f32 %v851_v9 }
 0x160   : > { %v951_v56 = vmul.f32 %v917_v0, %v679_v62  ;;  %v784_v6 = vmul.f32 %v750_v1, %v2455_v44 }
 0x161   : > { %v594_v59 = vpop.f32.mrf.mxu0  ;;  %v989_v58 = vpack.c.bf16 %v950_v3, %v948_v2  ;;  %v785_v8 = vmul.f32 %v751_v4, %v2459_v49 }
 0x162   : > { %v2473_v47 = vadd.f32 %v594_v59, %v2277_v11  ;;  %v647_v63 = vpop.f32.mrf.mxu1  ;;  %v990_v10 = vpack.c.bf16 %v951_v56, %v949_v5  ;;  %v818_v14 = vadd.f32 %v784_v6, %v2455_v44 }
 0x163   : > { %v2477_v15 = vadd.f32 %v647_v63, %v2280_v13  ;;  %1158 = vmatmul.bf16.gmra.mxu2 %v989_v58  ;;  %v819_v17 = vadd.f32 %v785_v8, %v2459_v49 }
 0x164   : > { %v718_v19 = vmul.f32 0.044715, %v2473_v47  ;;  %1211 = vmatmul.bf16.gmra.mxu3 %v990_v10  ;;  %v852_v20 = vmul.f32 0.7978846, %v818_v14  ;;  %v1821_v23 = vpop.eup %1820 }
 0x165   : > { %v719_v16 = vmul.f32 0.044715, %v2477_v15  ;;  %v853_v27 = vmul.f32 0.7978846, %v819_v17  ;;  %v1823_v7 = vpop.eup %1822  ;;  %v918_v34 = vadd.f32 1.0, %v1821_v23 }
 0x166   : > { %1824 = vtanh.f32 %v852_v20  ;;  %v752_v21 = vmul.f32 %v718_v19, %v2473_v47  ;;  %v919_v38 = vadd.f32 1.0, %v1823_v7 }
 0x167   : > { %1826 = vtanh.f32 %v853_v27  ;;  %v753_v22 = vmul.f32 %v719_v16, %v2477_v15  ;;  %v952_v52 = vmul.f32 %v918_v34, %v680_v37  ;;  %v684_v27 = vmul.f32 0.5, %v2473_v47 }
 0x168   : > { %v786_v24 = vmul.f32 %v752_v21, %v2473_v47  ;;  %v953_v41 = vmul.f32 %v919_v38, %v681_v46  ;;  %v962_v46 = vld [vmem:[#allocation2] sm:$0xff] }
 0x169   : > { %v596_v26 = vpop.f32.mrf.mxu0  ;;  %v787_v12 = vmul.f32 %v753_v22, %v2477_v15 }
 0x16a   : > { %v597_v28 = vadd.f32 %v596_v26, %v2277_v11  ;;  %v649_v30 = vpop.f32.mrf.mxu1  ;;  %v820_v32 = vadd.f32 %v786_v24, %v2473_v47  ;;  %v685_v24 = vmul.f32 0.5, %v2477_v15 }
 0x16b   : > { %v650_v33 = vadd.f32 %v649_v30, %v2280_v13  ;;  %v821_v35 = vadd.f32 %v787_v12, %v2477_v15 }
 0x16c   : > { %v1825_v43 = vpop.eup %1824  ;;  %v720_v36 = vmul.f32 0.044715, %v597_v28  ;;  %v854_v18 = vmul.f32 0.7978846, %v820_v32  ;;  %v686_v21 = vmul.f32 0.5, %v597_v28 }
 0x16d   : > { %v1827_v39 = vpop.eup %1826  ;;  %v721_v25 = vmul.f32 0.044715, %v650_v33  ;;  %v920_v29 = vadd.f32 1.0, %v1825_v43  ;;  %v855_v55 = vmul.f32 0.7978846, %v821_v35  ;;  %v687_v7 = vmul.f32 0.5, %v650_v33 }
 0x16e   : > { %v921_v50 = vadd.f32 1.0, %v1827_v39  ;;  %v754_v51 = vmul.f32 %v720_v36, %v597_v28  ;;  %1828 = vtanh.f32 %v854_v18 }
 0x16f   : > { %v954_v53 = vmul.f32 %v920_v29, %v682_v42  ;;  %v755_v54 = vmul.f32 %v721_v25, %v650_v33  ;;  %1830 = vtanh.f32 %v855_v55 }
 0x170   : > { %v955_v57 = vmul.f32 %v921_v50, %v683_v48  ;;  %v788_v61 = vmul.f32 %v754_v51, %v597_v28 }
 0x171   : > { %v599_v45 = vpop.f32.mrf.mxu0  ;;  %v991_v60 = vpack.c.bf16 %v954_v53, %v952_v52  ;;  %v789_v62 = vmul.f32 %v755_v54, %v650_v33  ;;  %v963_v52 = vld [vmem:[#allocation2 + $0x38] sm:$0xff] }
 0x172   : > { %v600_v44 = vadd.f32 %v599_v45, %v2277_v11  ;;  %v652_v0 = vpop.f32.mrf.mxu1  ;;  %v992_v1 = vpack.c.bf16 %v955_v57, %v953_v41  ;;  %v822_v31 = vadd.f32 %v788_v61, %v597_v28  ;;  %v964_v57 = vld [vmem:[#allocation2 + $0x78] sm:$0xff] }
 0x173   : > { %v653_v49 = vadd.f32 %v652_v0, %v2280_v13  ;;  %1163 = vmatmul.bf16.gmra.mxu2 %v991_v60  ;;  %v823_v40 = vadd.f32 %v789_v62, %v650_v33 }
 0x174   : > { %1216 = vmatmul.bf16.gmra.mxu3 %v992_v1  ;;  %v856_v2 = vmul.f32 0.7978846, %v822_v31  ;;  %v722_v3 = vmul.f32 0.044715, %v600_v44  ;;  %v1829_v6 = vpop.eup %1828  ;;  %v688_v38 = vmul.f32 0.5, %v600_v44 }
 0x175   : > { %v857_v4 = vmul.f32 0.7978846, %v823_v40  ;;  %v723_v9 = vmul.f32 0.044715, %v653_v49  ;;  %v1831_v59 = vpop.eup %1830  ;;  %v922_v13 = vadd.f32 1.0, %v1829_v6  ;;  %v689_v39 = vmul.f32 0.5, %v653_v49 }
 0x176   : > { %1832 = vtanh.f32 %v856_v2  ;;  %v756_v5 = vmul.f32 %v722_v3, %v600_v44  ;;  %v923_v19 = vadd.f32 1.0, %v1831_v59  ;;  %v966_v40 = vld [vmem:[#allocation2 + $0x20] sm:$0xff] }
 0x177   : > { %1834 = vtanh.f32 %v857_v4  ;;  %v757_v56 = vmul.f32 %v723_v9, %v653_v49  ;;  %v956_v12 = vmul.f32 %v922_v13, %v684_v27  ;;  %v970_v27 = vld [vmem:[#allocation2 + $0x28] sm:$0xff] }
 0x178   : > { %v790_v11 = vmul.f32 %v756_v5, %v600_v44  ;;  %v957_v32 = vmul.f32 %v923_v19, %v685_v24  ;;  %v967_v5 = vld [vmem:[#allocation2 + $0x8] sm:$0xff] }
 0x179   : > { %v601_v58 = vpop.f32.mrf.mxu0  ;;  %v791_v8 = vmul.f32 %v757_v56, %v653_v49 }
 0x17a   : > { %v654_v63 = vpop.f32.mrf.mxu1  ;;  %v824_v10 = vadd.f32 %v790_v11, %v600_v44  ;;  %v965_v44 = vld [vmem:[#allocation2 + $0x58] sm:$0xff]  ;;  %v968_v58 = vld [vmem:[#allocation2 + $0x70] sm:$0xff] }
 0x17b   : > { %v825_v14 = vadd.f32 %v791_v8, %v653_v49 }
 0x17c   : > { %v1833_v17 = vpop.eup %1832  ;;  %v858_v20 = vmul.f32 0.7978846, %v824_v10 }
 0x17d   : > { %v1835_v16 = vpop.eup %1834  ;;  %v924_v22 = vadd.f32 1.0, %v1833_v17  ;;  %v859_v23 = vmul.f32 0.7978846, %v825_v14  ;;  %v969_v14 = vld [vmem:[#allocation2 + $0x80] sm:$0xff] }
 0x17e   : > { %v925_v26 = vadd.f32 1.0, %v1835_v16  ;;  %1836 = vtanh.f32 %v858_v20 }
 0x17f   : > { %v958_v30 = vmul.f32 %v924_v22, %v686_v21  ;;  %1838 = vtanh.f32 %v859_v23 }
 0x180   : > { %v959_v34 = vmul.f32 %v925_v26, %v687_v7  ;;  %v971_v7 = vld [vmem:[#allocation2 + $0x48] sm:$0xff] }
 0x181   : > { %v993_v35 = vpack.c.bf16 %v958_v30, %v956_v12 }
 0x182   : > { %v994_v43 = vpack.c.bf16 %v959_v34, %v957_v32  ;;  %v972_v34 = vld [vmem:[#allocation2 + $0x10] sm:$0xff] }
 0x183   : > { %1168 = vmatmul.bf16.gmra.mxu2 %v993_v35 }
 0x184   : > { %1221 = vmatmul.bf16.gmra.mxu3 %v994_v43  ;;  %v1837_v36 = vpop.eup %1836 }
 0x185   : > { %v1839_v37 = vpop.eup %1838  ;;  %v926_v47 = vadd.f32 1.0, %v1837_v36 }
 0x186   : > { %v927_v28 = vadd.f32 1.0, %v1839_v37 }
 0x187   : > { %v960_v25 = vmul.f32 %v926_v47, %v688_v38  ;;  %v973_v47 = vld [vmem:[#allocation2 + $0x30] sm:$0xff] }
 0x188   : > { %v961_v15 = vmul.f32 %v927_v28, %v689_v39 }
 0x189   : > { %v995_v33 = vpack.c.bf16 %v960_v25, %v960_v25 }
 0x18a   : > { %v996_v42 = vpack.c.bf16 %v961_v15, %v961_v15  ;;  %v974_v15 = vld [vmem:[#allocation2 + $0x40] sm:$0xff] }
 0x193   : > { %1173 = vmatmul.bf16.gmra.mxu2 %v995_v33 }
 0x194   : > { %1226 = vmatmul.bf16.gmra.mxu3 %v996_v42 }
 0x196   : > { %v1134_v29 = vpop.f32.mrf.mxu2 }
 0x197   : > { %v1187_v48 = vpop.f32.mrf.mxu3 }
 0x198   : > { %v1188_v50 = vadd.f32 %v1187_v48, %v1134_v29  ;;  %v975_v48 = vld [vmem:[#allocation2 + $0x68] sm:$0xff] }
 0x19a   : > { %v1231_v51 = vadd.f32 %v1188_v50, %v962_v46 }
 0x19c   : > { %1248 = vst [vmem:[#allocation2] sm:$0xff] %v1231_v51 }
 0x19e   : > { %v1136_v18 = vpop.f32.mrf.mxu2 }
 0x19f   : > { %v1189_v53 = vpop.f32.mrf.mxu3 }
 0x1a0   : > { %v1190_v54 = vadd.f32 %v1189_v53, %v1136_v18  ;;  %v976_v53 = vld [vmem:[#allocation2 + $0x50] sm:$0xff] }
 0x1a2   : > { %v1232_v55 = vadd.f32 %v1190_v54, %v963_v52 }
 0x1a4   : > { %1249 = vst [vmem:[#allocation2 + $0x38] sm:$0xff] %v1232_v55 }
 0x1a6   : > { %v1139_v41 = vpop.f32.mrf.mxu2 }
 0x1a7   : > { %v1192_v61 = vpop.f32.mrf.mxu3 }
 0x1a8   : > { %v1193_v45 = vadd.f32 %v1192_v61, %v1139_v41  ;;  %v977_v61 = vld [vmem:[#allocation2 + $0x60] sm:$0xff] }
 0x1aa   : > { %v1233_v60 = vadd.f32 %v1193_v45, %v964_v57 }
 0x1ac   : > { %1250 = vst [vmem:[#allocation2 + $0x78] sm:$0xff] %v1233_v60 }
 0x1ae   : > { %v1141_v62 = vpop.f32.mrf.mxu2 }
 0x1af   : > { %v1194_v0 = vpop.f32.mrf.mxu3 }
 0x1b0   : > { %v1195_v1 = vadd.f32 %v1194_v0, %v1141_v62  ;;  %v978_v0 = vld [vmem:[#allocation2 + $0x18] sm:$0xff] }
 0x1b2   : > { %v1234_v31 = vadd.f32 %v1195_v1, %v965_v44 }
 0x1b4   : > { %1251 = vst [vmem:[#allocation2 + $0x58] sm:$0xff] %v1234_v31 }
 0x1b6   : > { %v1144_v49 = vpop.f32.mrf.mxu2 }
 0x1b7   : > { %v1197_v2 = vpop.f32.mrf.mxu3 }
 0x1b8   : > { %v1198_v3 = vadd.f32 %v1197_v2, %v1144_v49 }
 0x1ba   : > { %v1235_v4 = vadd.f32 %v1198_v3, %v966_v40 }
 0x1bc   : > { %1252 = vst [vmem:[#allocation2 + $0x20] sm:$0xff] %v1235_v4 }
 0x1be   : > { %v1146_v9 = vpop.f32.mrf.mxu2 }
 0x1bf   : > { %v1199_v56 = vpop.f32.mrf.mxu3 }
 0x1c0   : > { %v1200_v6 = vadd.f32 %v1199_v56, %v1146_v9 }
 0x1c2   : > { %v1236_v11 = vadd.f32 %v1200_v6, %v967_v5 }
 0x1c4   : > { %1253 = vst [vmem:[#allocation2 + $0x8] sm:$0xff] %v1236_v11 }
 0x1c6   : > { %v1149_v59 = vpop.f32.mrf.mxu2 }
 0x1c7   : > { %v1202_v8 = vpop.f32.mrf.mxu3 }
 0x1c8   : > { %v1203_v63 = vadd.f32 %v1202_v8, %v1149_v59 }
 0x1ca   : > { %v1237_v10 = vadd.f32 %v1203_v63, %v968_v58 }
 0x1cc   : > { %1254 = vst [vmem:[#allocation2 + $0x70] sm:$0xff] %v1237_v10 }
 0x1ce   : > { %v1151_v13 = vpop.f32.mrf.mxu2 }
 0x1cf   : > { %v1204_v17 = vpop.f32.mrf.mxu3 }
 0x1d0   : > { %v1205_v19 = vadd.f32 %v1204_v17, %v1151_v13 }
 0x1d2   : > { %v1238_v20 = vadd.f32 %v1205_v19, %v969_v14 }
 0x1d4   : > { %1255 = vst [vmem:[#allocation2 + $0x80] sm:$0xff] %v1238_v20 }
 0x1d6   : > { %v1154_v16 = vpop.f32.mrf.mxu2 }
 0x1d7   : > { %v1207_v21 = vpop.f32.mrf.mxu3 }
 0x1d8   : > { %v1208_v22 = vadd.f32 %v1207_v21, %v1154_v16 }
 0x1da   : > { %v1239_v23 = vadd.f32 %v1208_v22, %v970_v27 }
 0x1dc   : > { %1256 = vst [vmem:[#allocation2 + $0x28] sm:$0xff] %v1239_v23 }
 0x1de   : > { %v1156_v24 = vpop.f32.mrf.mxu2 }
 0x1df   : > { %v1209_v26 = vpop.f32.mrf.mxu3 }
 0x1e0   : > { %v1210_v12 = vadd.f32 %v1209_v26, %v1156_v24 }
 0x1e2   : > { %v1240_v30 = vadd.f32 %v1210_v12, %v971_v7 }
 0x1e4   : > { %1257 = vst [vmem:[#allocation2 + $0x48] sm:$0xff] %v1240_v30 }
 0x1e6   : > { %v1159_v32 = vpop.f32.mrf.mxu2 }
 0x1e7   : > { %v1212_v35 = vpop.f32.mrf.mxu3 }
 0x1e8   : > { %v1213_v43 = vadd.f32 %v1212_v35, %v1159_v32 }
 0x1ea   : > { %v1241_v36 = vadd.f32 %v1213_v43, %v972_v34 }
 0x1ec   : > { %1258 = vst [vmem:[#allocation2 + $0x10] sm:$0xff] %v1241_v36 }
 0x1ee   : > { %v1161_v37 = vpop.f32.mrf.mxu2 }
 0x1ef   : > { %v1214_v28 = vpop.f32.mrf.mxu3 }
 0x1f0   : > { %v1215_v38 = vadd.f32 %v1214_v28, %v1161_v37 }
 0x1f2   : > { %v1242_v39 = vadd.f32 %v1215_v38, %v973_v47 }
 0x1f4   : > { %1259 = vst [vmem:[#allocation2 + $0x30] sm:$0xff] %v1242_v39 }
 0x1f6   : > { %v1164_v25 = vpop.f32.mrf.mxu2 }
 0x1f7   : > { %v1217_v33 = vpop.f32.mrf.mxu3 }
 0x1f8   : > { %v1218_v42 = vadd.f32 %v1217_v33, %v1164_v25 }
 0x1fa   : > { %v1243_v29 = vadd.f32 %v1218_v42, %v974_v15 }
 0x1fc   : > { %1260 = vst [vmem:[#allocation2 + $0x40] sm:$0xff] %v1243_v29 }
 0x1fe   : > { %v1166_v46 = vpop.f32.mrf.mxu2 }
 0x1ff   : > { %v1219_v50 = vpop.f32.mrf.mxu3 }
 0x200   : > { %v1220_v51 = vadd.f32 %v1219_v50, %v1166_v46 }
 0x202   : > { %v1244_v18 = vadd.f32 %v1220_v51, %v975_v48 }
 0x204   : > { %1261 = vst [vmem:[#allocation2 + $0x68] sm:$0xff] %v1244_v18 }
 0x206   : > { %v1169_v52 = vpop.f32.mrf.mxu2 }
 0x207   : > { %v1222_v54 = vpop.f32.mrf.mxu3 }
 0x208   : > { %v1223_v55 = vadd.f32 %v1222_v54, %v1169_v52 }
 0x20a   : > { %v1245_v41 = vadd.f32 %v1223_v55, %v976_v53 }
 0x20c   : > { %1262 = vst [vmem:[#allocation2 + $0x50] sm:$0xff] %v1245_v41 }
 0x20e   : > { %v1171_v57 = vpop.f32.mrf.mxu2 }
 0x20f   : > { %v1224_v45 = vpop.f32.mrf.mxu3 }
 0x210   : > { %v1225_v60 = vadd.f32 %v1224_v45, %v1171_v57 }
 0x212   : > { %v1246_v62 = vadd.f32 %v1225_v60, %v977_v61 }
 0x214   : > { %1263 = vst [vmem:[#allocation2 + $0x60] sm:$0xff] %v1246_v62 }
 0x216   : > { %v1174_v44 = vpop.f32.mrf.mxu2 }
 0x217   : > { %v1227_v1 = vpop.f32.mrf.mxu3 }
 0x218   : > { %v1228_v31 = vadd.f32 %v1227_v1, %v1174_v44 }
 0x21a   : > { %v1247_v49 = vadd.f32 %v1228_v31, %v978_v0 }
 0x21b   : > { %1268 = sbr.rel (%p1634_p2) target bundleno = 565 (0x235), region = 64 }
 0x21c   : > { %1264 = vst [vmem:[#allocation2 + $0x18] sm:$0xff] %v1247_v49 }
 0x21e   : > { %v1176_v40 = vpop.f32.mrf.mxu2 }
 0x21f   : > { %v1229_v2 = vpop.f32.mrf.mxu3 }
 0x220   : > { %v1269_v3 = vld [vmem:[#allocation2] sm:$0xff]  ;;  %v1270_v9 = vld [vmem:[#allocation2 + $0x38] sm:$0xff]  ;;  %v1274_v8 = vld [vmem:[#allocation2 + $0x8] sm:$0xff] }
 0x221   : > { %v1840_v4 = vld [vmem:[%s2528_s4] ss:$0 sm:$0xff]  ;;  %v1271_v5 = vld [vmem:[#allocation2 + $0x78] sm:$0xff]  ;;  %v1275_v10 = vld [vmem:[#allocation2 + $0x70] sm:$0xff] }
 0x222   : > { %v1272_v56 = vld [vmem:[#allocation2 + $0x58] sm:$0xff]  ;;  %v1290_v6 = vadd.f32 %v1840_v4, %v1269_v3  ;;  %v1291_v11 = vadd.f32 %v1840_v4, %v1270_v9  ;;  %v1292_v59 = vadd.f32 %v1840_v4, %v1271_v5  ;;  %v1273_v58 = vld [vmem:[#allocation2 + $0x20] sm:$0xff]  ;;  %v1295_v17 = vadd.f32 %v1840_v4, %v1274_v8  ;;  %v1277_v19 = vld [vmem:[#allocation2 + $0x28] sm:$0xff] }
 0x223   : > { %v1293_v63 = vadd.f32 %v1840_v4, %v1272_v56  ;;  %v1294_v13 = vadd.f32 %v1840_v4, %v1273_v58  ;;  %v1276_v14 = vld [vmem:[#allocation2 + $0x80] sm:$0xff]  ;;  %v1296_v20 = vadd.f32 %v1840_v4, %v1275_v10  ;;  %v1278_v16 = vld [vmem:[#allocation2 + $0x48] sm:$0xff]  ;;  %v1279_v21 = vld [vmem:[#allocation2 + $0x10] sm:$0xff]  ;;  %v1298_v22 = vadd.f32 %v1840_v4, %v1277_v19 }
 0x224   : > { %1307 = vst [vmem:[#allocation11] sm:$0xff] %v1290_v6  ;;  %v1297_v27 = vadd.f32 %v1840_v4, %v1276_v14  ;;  %v1280_v23 = vld [vmem:[#allocation2 + $0x30] sm:$0xff]  ;;  %v1299_v24 = vadd.f32 %v1840_v4, %v1278_v16  ;;  %v1281_v7 = vld [vmem:[#allocation2 + $0x40] sm:$0xff]  ;;  %v1300_v26 = vadd.f32 %v1840_v4, %v1279_v21  ;;  %v1282_v12 = vld [vmem:[#allocation2 + $0x68] sm:$0xff] }
 0x225   : > { %1308 = vst [vmem:[#allocation11 + $0x8] sm:$0xff] %v1291_v11  ;;  %v1301_v30 = vadd.f32 %v1840_v4, %v1280_v23  ;;  %v1283_v32 = vld [vmem:[#allocation2 + $0x50] sm:$0xff]  ;;  %v1302_v34 = vadd.f32 %v1840_v4, %v1281_v7  ;;  %v1284_v35 = vld [vmem:[#allocation2 + $0x60] sm:$0xff]  ;;  %v1303_v43 = vadd.f32 %v1840_v4, %v1282_v12  ;;  %v1285_v36 = vld [vmem:[#allocation2 + $0x18] sm:$0xff] }
 0x226   : > { %1309 = vst [vmem:[#allocation11 + $0x10] sm:$0xff] %v1292_v59  ;;  %v1304_v37 = vadd.f32 %v1840_v4, %v1283_v32  ;;  %v1305_v47 = vadd.f32 %v1840_v4, %v1284_v35  ;;  %v1306_v28 = vadd.f32 %v1840_v4, %v1285_v36 }
 0x227   : > { %1310 = vst [vmem:[#allocation11 + $0x18] sm:$0xff] %v1293_v63 }
 0x228   : > { %1311 = vst [vmem:[#allocation11 + $0x20] sm:$0xff] %v1294_v13 }
 0x229   : > { %1312 = vst [vmem:[#allocation11 + $0x28] sm:$0xff] %v1295_v17 }
 0x22a   : > { %1313 = vst [vmem:[#allocation11 + $0x30] sm:$0xff] %v1296_v20 }
 0x22b   : > { %1314 = vst [vmem:[#allocation11 + $0x38] sm:$0xff] %v1297_v27 }
 0x22c   : > { %1315 = vst [vmem:[#allocation11 + $0x40] sm:$0xff] %v1298_v22 }
 0x22d   : > { %1316 = vst [vmem:[#allocation11 + $0x48] sm:$0xff] %v1299_v24 }
 0x22e   : > { %1317 = vst [vmem:[#allocation11 + $0x50] sm:$0xff] %v1300_v26 }
 0x22f   : > { %1318 = vst [vmem:[#allocation11 + $0x58] sm:$0xff] %v1301_v30 }
 0x230   : > { %1319 = vst [vmem:[#allocation11 + $0x60] sm:$0xff] %v1302_v34 }
 0x231   : > { %1320 = vst [vmem:[#allocation11 + $0x68] sm:$0xff] %v1303_v43 }
 0x232   : > { %1321 = vst [vmem:[#allocation11 + $0x70] sm:$0xff] %v1304_v37 }
 0x233   : > { %1322 = vst [vmem:[#allocation11 + $0x78] sm:$0xff] %v1305_v47 }
 0x234   : > { %1323 = vst [vmem:[#allocation11 + $0x80] sm:$0xff] %v1306_v28 }
 0x235 PF: > { %p1712_p3 = scmp.eq.s32.totalorder %s2165_s27, 1  ;;  %s1334_s9 = sshll.u32 %s2529_s5, 4  ;;  %s1335_s9 = int_to_ptr.hbm [resolvable:$true] %s1334_s9 }
 0x236   : > { %s2060_s10 = smov [#allocation11]   ;;  %s2061_s17 = smov 128  }
 0x237   : > { %s1332_s11 = sshll.u32 %s2060_s10, 4  ;;  %s2062_s25 = smov 8   ;;  %s1333_s11 = int_to_ptr.vmem [resolvable:$true] %s1332_s11 }
 0x238   : > { %1692 = dma.vmem_to_hbm [thread:$0]  (%p1712_p3), %s1333_s11, 2176, %s1335_s9, [#allocation5], %s2061_s17, %s2061_s17, %s2062_s25  }
 0x239   : > { %2026 = dma.done.wait (%p1712_p3), [#allocation5], 2176  }
 0x23a   : > { %2028 = vsyncadd (%p1712_p3), [#allocation5], 4294965120 }
 0x23b PF: > { %s2547_s28 = sld [smem:[#allocation17_spill]]  ;;  %s2551_s18 = smov %s2035_s19 }
 0x23c   : > { %s2548_s30 = sld [smem:[#allocation16_spill]]  ;;  %s2553_s21 = smov %s2047_s22 }
 0x23d   : > { %s2549_s20 = sld [smem:[#allocation19_spill]] }
 0x23e   : > { %s2550_s27 = sld [smem:[#allocation18_spill]] }
 0x241   : > { %s23_s23 = sadd.s32 1, %s2547_s28  }
 0x242   : > { %p20_p4 = scmp.ge.s32.totalorder %s23_s23, 4   ;;  %s2552_s19 = smov %s2548_s30 }
 0x244   : > { %s2554_s22 = smov %s2550_s27  ;;  %22 = sbr.rel (!%p20_p4) target bundleno = 11 (0xb), region = 116 }
 0x249   :  { %1351 = vsyncpa [#allocation4], 1 }
 0x24a   :  { %1353 = vsyncpa [#allocation4 + $0x1], 1 }
 0x24b   :  { %1354 = vsyncpa [#allocation7], 1 }
 0x24c   :  { %1356 = vsyncpa [#allocation7 + $0x1], 1 }
 0x24d   :  { %1357 = vsyncpa [#allocation10], 1 }
 0x24e   :  { %1359 = vsyncpa [#allocation10 + $0x1], 1 }
 0x24f   :  { %1360 = vsyncpa [#allocation5], 1 }
 0x250   :  { %1362 = vsyncpa [#allocation5 + $0x1], 1 }

</bundles_post_ra>
